<compile_context>
chip_gen: v7x
topology: tpu7x:2x2x1
jax: 0.10.0
libtpu: 0.0.40
codegen_flags: <defaults>
</compile_context>

<pallas_src>
import functools

import jax
import jax.numpy as jnp
from jax.experimental import pallas as pl
from jax.experimental.pallas import tpu as pltpu


def adapter_kernel(x_ref, w1_ref, w2_ref, o_ref):
    """One batch tile: two MXU matmuls + VPU ReLUs, everything stays in vregs/VMEM."""
    x = x_ref[...].astype(w1_ref.dtype)                                 # in-kernel cast (free)
    h = jnp.dot(x, w1_ref[...], preferred_element_type=jnp.float32)     # (TB, H)  f32 acc
    h = jnp.maximum(h, 0.0).astype(w2_ref.dtype)                        # ReLU #1, back to bf16
    y = jnp.dot(h, w2_ref[...], preferred_element_type=jnp.float32)     # (TB, C)  f32 acc
    o_ref[...] = jnp.maximum(y, 0.0).astype(o_ref.dtype)                # ReLU #2 + store


def _vmem_capacity_bytes() -> int:
    """Physical VMEM per TensorCore; conservative fallback if the query is unavailable."""
    try:
        return int(pltpu.get_tpu_info().vmem_capacity_bytes)
    except Exception:
        return 64 * 1024 * 1024          # v7x per-TC size — safe lower bound everywhere


@functools.partial(jax.jit, static_argnames=("compute_dtype",))
def adapter_forward(x, w1, w2, *, compute_dtype=jnp.bfloat16):
    """x: (..., c_in), w1: (c_in, hidden), w2: (hidden, c_in) -> (..., c_in).

    Weights are stored pre-transposed relative to PyTorch (w1 = W1.T, w2 = W2.T).
    """
    orig_shape = x.shape
    out_dtype = x.dtype
    c_in, hidden = w1.shape
    assert w2.shape == (hidden, c_in), "w2 must be (hidden, c_in)"
    assert orig_shape[-1] == c_in, "trailing dim of x must be c_in"

    # Linear acts on the trailing feature axis only -> flatten leading dims (no copy in HBM
    # beyond what XLA needs for layout; no zero-fill, no batch padding).
    x2 = x.reshape(-1, c_in)
    B = x2.shape[0]

    # Small, one-time weight cast (bf16 halves weight DMA bytes and VMEM residency).
    w1c = w1.astype(compute_dtype)
    w2c = w2.astype(compute_dtype)

    in_itemsize = jnp.dtype(x.dtype).itemsize
    w_itemsize = jnp.dtype(compute_dtype).itemsize
    out_itemsize = jnp.dtype(out_dtype).itemsize

    # --- per-chip VMEM budget -------------------------------------------------------------
    vmem_cap = _vmem_capacity_bytes()                       # 128 MiB v5e/v6e, 64 MiB v7x/TC
    vmem_limit = min(vmem_cap * 3 // 4, 100 * 1024 * 1024)  # leave headroom for Mosaic

    # Resident weights: constant index_map -> no per-step re-DMA, but budget them as if
    # double-buffered (conservative).
    weight_bytes = 2 * 2 * c_in * hidden * w_itemsize
    # TODO(synk): if weight_bytes ever exceeds ~vmem_limit/2 (huge adapters on v7x), add a
    # feature-chunk grid axis ("arbitrary") instead of assuming fully-resident weights, and
    # single-buffer the weight blocks (pipeline_mode=pl.Buffered(1)).

    # Per-batch-row VMEM cost: double-buffered x/out DMA tiles + in-kernel intermediates
    # (f32 h accumulator, its compute-dtype copy, f32 second-matmul accumulator).
    per_row = (2 * c_in * in_itemsize
               + 2 * c_in * out_itemsize
               + hidden * (4 + w_itemsize)
               + c_in * 4)
    avail = max(vmem_limit - weight_bytes, 0)
    TB = int(avail // max(per_row, 1))
    TB = max(8, min(2048, (TB // 8) * 8))    # multiple of 8 sublanes, amortize grid-step cost
    if TB >= B:
        TB = B                               # single full-batch block (full-dim block is legal)
    grid = (pl.cdiv(B, TB),)                 # partial last block handled/masked by Pallas

    cost = pl.CostEstimate(
        flops=4 * B * c_in * hidden,                               # two matmuls
        transcendentals=0,
        bytes_accessed=(B * c_in * (in_itemsize + out_itemsize)    # x read + out write
                        + 2 * c_in * hidden * w_itemsize),         # both weights
    )

    out = pl.pallas_call(
        adapter_kernel,
        out_shape=jax.ShapeDtypeStruct((B, c_in), out_dtype),
        grid=grid,
        in_specs=[
            pl.BlockSpec((TB, c_in), lambda i: (i, 0)),       # x: tiled along batch only
            pl.BlockSpec((c_in, hidden), lambda i: (0, 0)),   # w1: resident (constant index)
            pl.BlockSpec((hidden, c_in), lambda i: (0, 0)),   # w2: resident (constant index)
        ],
        out_specs=pl.BlockSpec((TB, c_in), lambda i: (i, 0)),
        compiler_params=pltpu.CompilerParams(
            dimension_semantics=("parallel",),                # independent batch tiles
            vmem_limit_bytes=int(vmem_limit),
        ),
        cost_estimate=cost,
    )(x2, w1c, w2c)

    # No slicing / dtype fixup needed: kernel writes (B, c_in) in out_dtype directly.
    return out.reshape(orig_shape)


def adapter_reference(x, w1, w2):
    """Pure-JAX reference of the PyTorch forward (float32)."""
    h = jnp.maximum(x @ w1, 0.0)
    return jnp.maximum(h @ w2, 0.0)


if __name__ == "__main__":
    # Adapter(c_in=32, reduction=4) -> hidden = 8
    c_in = 32
    reduction = 4
    hidden = c_in // reduction
    batch = 8

    key = jax.random.PRNGKey(0)
    kx, k1, k2, kx3 = jax.random.split(key, 4)

    x = jax.random.normal(kx, (batch, c_in), dtype=jnp.float32)
    # Deterministic "Kaiming-like" init; stored transposed vs torch (y = x @ W.T).
    w1 = jax.random.normal(k1, (c_in, hidden), dtype=jnp.float32) * (1.0 / jnp.sqrt(c_in))
    w2 = jax.random.normal(k2, (hidden, c_in), dtype=jnp.float32) * (1.0 / jnp.sqrt(hidden))

    ref = adapter_reference(x, w1, w2)

    # f32 MXU path — exact (within f32 accumulation) match against the reference.
    out_f32 = jax.block_until_ready(adapter_forward(x, w1, w2, compute_dtype=jnp.float32))
    assert out_f32.shape == (batch, c_in)
    assert jnp.allclose(out_f32, ref, atol=1e-5, rtol=1e-5), "f32 Pallas output mismatch"

    # Default bf16-operand MXU path (v5e/v6e/v7x fast path), f32 accumulation.
    out_bf16 = jax.block_until_ready(adapter_forward(x, w1, w2))
    assert out_bf16.shape == (batch, c_in)
    assert jnp.allclose(out_bf16, ref, atol=5e-2, rtol=5e-2), "bf16 Pallas output mismatch"

    # Leading-dims path (Linear over the trailing axis only), e.g. (batch, seq, c_in).
    x3 = jax.random.normal(kx3, (2, 5, c_in), dtype=jnp.float32)
    ref3 = adapter_reference(x3, w1, w2)
    out3 = jax.block_until_ready(adapter_forward(x3, w1, w2, compute_dtype=jnp.float32))
    assert out3.shape == (2, 5, c_in)
    assert jnp.allclose(out3, ref3, atol=1e-5, rtol=1e-5), "3-D Pallas output mismatch"

    print("KERNEL_OK")
</pallas_src>

<mosaic_0001>
module attributes {stable_mosaic.version = 11 : i64} {
  func.func @adapter_kernel(%arg0: i32, %arg1: memref<8x32xf32, #tpu.memory_space<vmem>>, %arg2: memref<32x8xf32, #tpu.memory_space<vmem>>, %arg3: memref<8x32xf32, #tpu.memory_space<vmem>>, %arg4: memref<8x32xf32, #tpu.memory_space<vmem>>) attributes {dimension_semantics = [#tpu.dimension_semantics<parallel>], iteration_bounds = array<i64: 1>, scalar_prefetch = 0 : i64, scratch_operands = 0 : i64, tpu.core_type = #tpu.core_type<tc>, window_params = [{transform_indices = @transform_0, window_bounds = array<i64: 8, 32>}, {pipeline_mode = #tpu.pipeline_mode<synchronous>, transform_indices = @transform_1, window_bounds = array<i64: 32, 8>}, {pipeline_mode = #tpu.pipeline_mode<synchronous>, transform_indices = @transform_2, window_bounds = array<i64: 8, 32>}, {transform_indices = @transform_3, window_bounds = array<i64: 8, 32>}]} {
    %c0 = arith.constant 0 : index
    %c0_0 = arith.constant 0 : index
    %0 = vector.load %arg1[%c0, %c0_0] : memref<8x32xf32, #tpu.memory_space<vmem>>, vector<8x32xf32>
    %c0_1 = arith.constant 0 : index
    %c0_2 = arith.constant 0 : index
    %1 = vector.load %arg2[%c0_1, %c0_2] : memref<32x8xf32, #tpu.memory_space<vmem>>, vector<32x8xf32>
    %cst = arith.constant dense<0.000000e+00> : vector<8x8xf32>
    %2 = tpu.matmul %0, %1, %cst {dimension_numbers = #tpu.dot_dimension_numbers<[1], [0], [0], [1], [0, 0, 1, 1], [], []>} : vector<8x32xf32>, vector<32x8xf32>, vector<8x8xf32> -> vector<8x8xf32>
    %cst_3 = arith.constant 0.000000e+00 : f32
    %3 = vector.broadcast %cst_3 : f32 to vector<8x8xf32>
    %4 = arith.maximumf %2, %3 : vector<8x8xf32>
    %c0_4 = arith.constant 0 : index
    %c0_5 = arith.constant 0 : index
    %5 = vector.load %arg3[%c0_4, %c0_5] : memref<8x32xf32, #tpu.memory_space<vmem>>, vector<8x32xf32>
    %cst_6 = arith.constant dense<0.000000e+00> : vector<8x32xf32>
    %6 = tpu.matmul %4, %5, %cst_6 {dimension_numbers = #tpu.dot_dimension_numbers<[1], [0], [0], [1], [0, 0, 1, 1], [], []>} : vector<8x8xf32>, vector<8x32xf32>, vector<8x32xf32> -> vector<8x32xf32>
    %cst_7 = arith.constant 0.000000e+00 : f32
    %7 = vector.broadcast %cst_7 : f32 to vector<8x32xf32>
    %8 = arith.maximumf %6, %7 : vector<8x32xf32>
    %c0_8 = arith.constant 0 : index
    %c0_9 = arith.constant 0 : index
    %9 = vector.load %arg4[%c0_8, %c0_9] : memref<8x32xf32, #tpu.memory_space<vmem>>, vector<8x32xf32>
    tpu.vector_store %arg4[%c0_8, %c0_9], %8 {strides = array<i32>} : memref<8x32xf32, #tpu.memory_space<vmem>>, vector<8x32xf32>,
    return
  }
  func.func @transform_0(%arg0: i32) -> (i32, i32) {
    %c0_i32 = arith.constant 0 : i32
    %c0_i32_0 = arith.constant 0 : i32
    return %arg0, %c0_i32 : i32, i32
  }
  func.func @transform_1(%arg0: i32) -> (i32, i32) {
    %c0_i32 = arith.constant 0 : i32
    %c0_i32_0 = arith.constant 0 : i32
    %c0_i32_1 = arith.constant 0 : i32
    return %c0_i32, %c0_i32_0 : i32, i32
  }
  func.func @transform_2(%arg0: i32) -> (i32, i32) {
    %c0_i32 = arith.constant 0 : i32
    %c0_i32_0 = arith.constant 0 : i32
    %c0_i32_1 = arith.constant 0 : i32
    return %c0_i32, %c0_i32_0 : i32, i32
  }
  func.func @transform_3(%arg0: i32) -> (i32, i32) {
    %c0_i32 = arith.constant 0 : i32
    %c0_i32_0 = arith.constant 0 : i32
    return %arg0, %c0_i32 : i32, i32
  }
}

</mosaic_0001>

<bundles_post_ra>
// kernel: adapter_forward.1
= control target key start
LH: loop header
LB: loop body
LE: loop exit
PB: predicated region body
PF: predicated region fallthrough
CT: control target
= control target key end

     0   :  { %v245_v3 = vmov 0.0|0.0   ;;  %vm246_vm0 = vmmov 0   ;;  %v247_v6 = vmov 0.0   ;;  %s299_s0 = inlined_call_operand.vmem [shape: f32[8,32], index: 0, kind: input, shape index: {}]   ;;  %s300_s1 = inlined_call_operand.vmem [shape: f32[32,8], index: 1, kind: input, shape index: {}]   ;;  %s301_s2 = inlined_call_operand.vmem [shape: f32[8,32], index: 2, kind: input, shape index: {}]   ;;  %s302_s3 = inlined_call_operand.hbm [shape: f32[8,32], index: 3, kind: output, shape index: {}]  }
   0x1   :  { %v16_v0 = vld [vmem:[%s300_s1] sm:$0xff]  ;;  %v17_v1 = vld [vmem:[%s300_s1 + $0x8] sm:$0xff]  ;;  %v18_v2 = vld [vmem:[%s300_s1 + $0x10] sm:$0xff]  ;;  %211 = vmatprep.subr.bf16.mxu0 %v245_v3  ;;  %203 = vmatprep.mubr.msk.f32.mxu0 %vm246_vm0, %v247_v6 }
   0x2   :  { %v212_v4 = vpack.c.bf16 %v17_v1, %v16_v0  ;;  %v19_v5 = vld [vmem:[%s300_s1 + $0x18] sm:$0xff] }
   0x3   :  { %8 = vsyncpa [#allocation3], 0  ;;  %206 = vmatprep.subr.mxu1 %v247_v6  ;;  %208 = vmatprep.mubr.msk.f32.mxu1 %vm246_vm0, %v247_v6  ;;  %v215_v7 = vpack.c.bf16 %v19_v5, %v18_v2  ;;  %v15_v8 = vld [vmem:[%s299_s0] sm:$0xff]  ;;  %vm20_vm1 = vcmask 261120   ;;  %vm96_vm2 = vcmask 64512   ;;  %s248_s1 = smov [#allocation2]  }
   0x4   :  { %213 = vmatpush3.bf16.msra.mxu0 %v212_v4  ;;  %v95_v9 = vld [vmem:[%s301_s2] sm:$0xff]  ;;  %s178_s24 = sshll.u32 %s248_s1, 4  ;;  %s179_s24 = int_to_ptr.vmem [resolvable:$true] %s178_s24 }
   0x5   :  { %214 = vmatprep.subr.bf16.mxu0 %v245_v3  ;;  %207 = vmatpush3.msra.mxu1 %v95_v9  ;;  %s221_s0 = scalar_lea.vmem %s179_s24, 128  ;;  %p226_p1 = scmp.lt.s32.totalorder %s179_s24, %s179_s24 }
   0x6   :  { %p222_p0 = scmp.ne.s32.totalorder %s179_s24, %s221_s0  ;;  %p227_p2 = scmp.lt.s32.totalorder %s221_s0, %s221_s0 }
   0x8   :  { %216 = vmatpush3.bf16.msra.mxu0 %v215_v7  ;;  %p228_p3 = por %p227_p2, %p226_p1 }
   0xa   :  { %p229_p4 = pnand %p228_p3, %p222_p0 }
   0xb   :  { %204 = vmatmul.mubr.msk.f32.vlgmr.msra.gmra.mrb[0].mxu0 %vm20_vm1, %v15_v8 }
  0xde   :  { %v90_v10 = vpop.f32.mrb[0].mxu0 }
  0xdf   :  { %v94_v11 = vmax.f32 %v90_v10, 0.0  ;;  %v205_v12 = vpop.f32.mrb[1].mxu0 }
  0xe1   :  { %209 = vmatmul.mubr.msk.f32.vlgmr.msra.gmra.mrb[0].mxu1 %vm96_vm2, %v94_v11 }
 0x1b4   :  { %v166_v13 = vpop.f32.mrb[0].mxu1 }
 0x1b5   :  { %v170_v14 = vmax.f32 %v166_v13, 0.0  ;;  %v210_v15 = vpop.f32.mrb[1].mxu1 }
 0x1b7   :  { %171 = vst.msk [vmem:[#allocation2] sm:$0xff] %vm20_vm1, %v170_v14 }
 0x1b8   :  { %232 = shalt.err (!%p229_p4)
}
 0x1b9   :  { %s233_s26 = scalar_lea.hbm %s302_s3, 128 }
 0x1ba   :  { %p234_p5 = scmp.ne.s32.totalorder %s302_s3, %s233_s26  ;;  %p237_p6 = scmp.lt.u32.totalorder %s233_s26, %s302_s3 }
 0x1bc   :  { %p239_p7 = pnand %p237_p6, %p234_p5 }
 0x1be   :  { %242 = shalt.err (!%p239_p7)
}
 0x1bf   :  { %181 = dma.vmem_to_hbm [thread:$0]  %s179_s24, 128, %s302_s3, [#allocation3]  }
 0x1c0   :  { %243 = dma.done.wait [#allocation3], 128  }
 0x1c1   :  { %244 = vsyncadd [#allocation3], 4294967168 }
 0x1c2   :  { %185 = vsyncpa [#allocation3], 1 }

</bundles_post_ra>
